<compile_context>
chip_gen: v6e
topology: v6e:2x2x1
jax: 0.10.0
libtpu: 0.0.40
codegen_flags: <defaults>
</compile_context>

<pallas_src>
import functools

import jax
import jax.numpy as jnp
from jax import lax
from jax.experimental import pallas as pl
from jax.experimental.pallas import tpu as pltpu

LN_EPS = 1e-5  # nn.LayerNorm default


def _round_up(x: int, m: int) -> int:
    return ((x + m - 1) // m) * m


def _epilogue(x_ref, z, b_ref, gamma_ref, beta_ref, o_ref):
    """Residual add + LayerNorm over the last axis; all math in f32."""
    # Dropout (eval mode) is the identity.
    # TODO(synk): training-mode dropout would use pltpu.prng_seed /
    # pltpu.stateful_bernoulli; the eval-mode forward is the identity map.
    h = x_ref[...].astype(jnp.float32) + z + b_ref[...]
    mean = jnp.mean(h, axis=-1, keepdims=True)
    cent = h - mean
    var = jnp.mean(cent * cent, axis=-1, keepdims=True)
    hn = cent * lax.rsqrt(var + LN_EPS)                 # rsqrt -> EUP slot
    o_ref[...] = (hn * gamma_ref[...] + beta_ref[...]).astype(o_ref.dtype)


def _kernel_resident(x_ref, w_ref, b_ref, gamma_ref, beta_ref, o_ref):
    # Whole W resident in VMEM: one MXU matmul per row tile, no scratch
    # accumulator -- the result value flows straight into the epilogue.
    z = jnp.dot(x_ref[...], w_ref[...], preferred_element_type=jnp.float32)
    _epilogue(x_ref, z, b_ref, gamma_ref, beta_ref, o_ref)


def _kernel_streamed(x_ref, w_ref, b_ref, gamma_ref, beta_ref, o_ref, acc_ref,
                     *, tk: int, nk: int):
    # W streamed along the contraction axis as (tk, D) slabs; f32 accumulator.
    k = pl.program_id(1)
    start = pl.multiple_of(k * tk, tk)                  # tk is a multiple of 128
    # 128-aligned lane-axis slice of the resident x tile; expected to lower to
    # direct vreg loads (check pl.lower_as_mlir if a VMEM copy is suspected).
    x_blk = x_ref[:, pl.ds(start, tk)]
    partial = jnp.dot(x_blk, w_ref[...], preferred_element_type=jnp.float32)

    @pl.when(k == 0)
    def _first():
        acc_ref[...] = partial                          # direct write, no zero+add

    @pl.when(jnp.logical_and(k > 0, k < nk - 1))
    def _middle():
        acc_ref[...] += partial

    @pl.when(k == nk - 1)
    def _last():
        # Fuse the final partial into the epilogue (no VMEM round trip).
        z = acc_ref[...] + partial
        _epilogue(x_ref, z, b_ref, gamma_ref, beta_ref, o_ref)


def _vmem_budget_bytes():
    """(soft budget, physical capacity) in bytes, generation-aware."""
    try:
        cap = int(pltpu.get_tpu_info().vmem_capacity_bytes)
    except Exception:
        cap = 64 * 1024 * 1024       # conservative fallback: v7x has the smallest VMEM
    return (3 * cap) // 4, cap       # ~96 MiB on v5e/v6e, ~48 MiB on v7x


def _choose_tiles(rows, D, x_itemsize, w_itemsize, tm_req, budget, *,
                  force_stream=False):
    """Pick (tm, tk, nk, vmem_need_bytes) under the soft VMEM budget."""
    param_bytes = 3 * D * 4                             # bias/gamma/beta (f32)

    def tile_bytes(tm, need_acc):
        io = 4 * tm * D * x_itemsize                    # x + out, double-buffered
        acc = tm * D * 4 if need_acc else 0             # f32 accumulator scratch
        epi = 3 * tm * D * 4                            # f32 epilogue temporaries
        return io + acc + epi

    def need(tm, tk, nk):
        w_bufs = 1 if nk == 1 else 2                    # resident W single-buffered
        return w_bufs * tk * D * w_itemsize + param_bytes + tile_bytes(tm, nk > 1)

    # Candidate row tiles, descending.  Floor at a multiple of 256 before
    # dropping further only as a last resort (tiny tm multiplies W re-streams
    # and per-grid-step overhead).
    tm_max = max(8, _round_up(min(tm_req, rows), 8))
    tms = [tm_max]
    t = tm_max
    while t > 256:
        t = max(256, _round_up(t // 2, 256))
        if t != tms[-1]:
            tms.append(t)
    while t > 8:
        t = max(8, t // 2)
        tms.append(t)

    # K-slab candidates for streaming W (multiples of 128, largest first).
    stream_tks = [c for c in (512, 256, 128) if D % c == 0 and c < D]

    # 1) Prefer a fully VMEM-resident W (fetched from HBM exactly once).
    #    Do not shrink tm below 256 just to keep W resident.
    if not force_stream:
        for tm in tms:
            if tm < 256 and tm_max >= 256:
                break
            if need(tm, D, 1) <= budget:
                return tm, D, 1, need(tm, D, 1)

    # 2) Stream W along K.  Shrink tk before tm (halving tm doubles the number
    #    of W re-streams and grid steps; halving tk only shortens the K chain).
    for tm in tms:
        for c in stream_tks:
            if need(tm, c, D // c) <= budget:
                return tm, c, D // c, need(tm, c, D // c)

    # 3) Last resort (very large / awkward D): smallest tiles; caller clamps
    #    vmem_limit to the physical capacity instead of a hard 48 MiB cap.
    tm = tms[-1]
    if stream_tks:
        c = stream_tks[-1]
        return tm, c, D // c, need(tm, c, D // c)
    return tm, D, 1, need(tm, D, 1)


def residual_forward(x, w, b, gamma, beta, *, tm=512, force_stream=False):
    """x: [B, S, D]. Returns LayerNorm(x + (x @ W + b)) * gamma + beta."""
    B, S, D = x.shape
    rows = B * S

    # Keep the MXU precision path intentional: run the matmul in the
    # activation dtype (accumulation is always f32).
    if w.dtype != x.dtype:
        w = w.astype(x.dtype)

    x_itemsize = jnp.dtype(x.dtype).itemsize
    w_itemsize = jnp.dtype(w.dtype).itemsize

    budget, cap = _vmem_budget_bytes()
    tm_eff, tk, nk, vmem_need = _choose_tiles(
        rows, D, x_itemsize, w_itemsize, tm, budget, force_stream=force_stream)
    n_row_tiles = pl.cdiv(rows, tm_eff)

    x2 = x.reshape(rows, D)
    # Cast the small constants to f32 once here (not per grid step).
    b2 = b.reshape(1, D).astype(jnp.float32)
    g2 = gamma.reshape(1, D).astype(jnp.float32)
    be2 = beta.reshape(1, D).astype(jnp.float32)

    # Real HBM traffic: x read + out write + W (re-read per row tile when
    # streamed, once when resident) + the small constants.
    w_reads = (n_row_tiles if nk > 1 else 1) * D * D * w_itemsize
    bytes_accessed = int(2 * rows * D * x_itemsize + w_reads + 3 * D * 4)
    cost = pl.CostEstimate(flops=int(2 * rows * D * D + 10 * rows * D),
                           transcendentals=int(rows),
                           bytes_accessed=bytes_accessed)

    vmem_limit = int(max(32 * 1024 * 1024, vmem_need + (8 << 20)))
    vmem_limit = int(min(vmem_limit, cap - (4 << 20)))

    def build_and_run(single_buffer_consts: bool):
        def const_spec(shape, index_map):
            # Constant-index inputs don't need a second pipeline buffer.
            if single_buffer_consts:
                return pl.BlockSpec(shape, index_map,
                                    pipeline_mode=pl.Buffered(1))
            return pl.BlockSpec(shape, index_map)

        if nk == 1:
            grid = (n_row_tiles,)
            row = lambda i: (i, 0)
            zero = lambda i: (0, 0)
            in_specs = [
                pl.BlockSpec((tm_eff, D), row),   # x row tile
                const_spec((D, D), zero),         # resident W (fetched once)
                const_spec((1, D), zero),         # bias
                const_spec((1, D), zero),         # gamma
                const_spec((1, D), zero),         # beta
            ]
            out_specs = pl.BlockSpec((tm_eff, D), row)
            scratch = []
            kernel = _kernel_resident
            dims = ("parallel",)
        else:
            grid = (n_row_tiles, nk)
            row = lambda i, k: (i, 0)
            slab = lambda i, k: (k, 0)
            zero = lambda i, k: (0, 0)
            in_specs = [
                pl.BlockSpec((tm_eff, D), row),   # x rows (resident over k)
                pl.BlockSpec((tk, D), slab),      # W K-slab (streamed)
                const_spec((1, D), zero),         # bias
                const_spec((1, D), zero),         # gamma
                const_spec((1, D), zero),         # beta
            ]
            out_specs = pl.BlockSpec((tm_eff, D), row)
            scratch = [pltpu.VMEM((tm_eff, D), jnp.float32)]
            kernel = functools.partial(_kernel_streamed, tk=tk, nk=nk)
            dims = ("parallel", "arbitrary")

        out_flat = pl.pallas_call(
            kernel,
            out_shape=jax.ShapeDtypeStruct((rows, D), x.dtype),
            grid_spec=pltpu.PrefetchScalarGridSpec(
                num_scalar_prefetch=0,
                grid=grid,
                in_specs=in_specs,
                out_specs=out_specs,
                scratch_shapes=scratch,
            ),
            compiler_params=pltpu.CompilerParams(
                dimension_semantics=dims,
                vmem_limit_bytes=vmem_limit,
            ),
            cost_estimate=cost,
        )(x2, w, b2, g2, be2)
        return jax.block_until_ready(out_flat)

    try:
        out2 = build_and_run(True)
    except Exception:
        # pipeline_mode=pl.Buffered(1) unavailable/rejected -> default buffering.
        out2 = build_and_run(False)

    return out2.reshape(B, S, D)


def residual_reference(x, w, b, gamma, beta):
    z = jnp.einsum("bsd,de->bse", x, w) + b
    h = x + z
    mean = jnp.mean(h, axis=-1, keepdims=True)
    var = jnp.mean((h - mean) ** 2, axis=-1, keepdims=True)
    hn = (h - mean) / jnp.sqrt(var + LN_EPS)
    return hn * gamma + beta


if __name__ == "__main__":
    key = jax.random.PRNGKey(0)
    k1, k2, k3, k4, k5, k6 = jax.random.split(key, 6)

    # 1) Resident-W fast path (the module's dim_model = 128 LayerNorm dim).
    B, S, D = 2, 8, 128
    x = jax.random.normal(k1, (B, S, D), dtype=jnp.float32)
    # Deterministic parameter init (synthetic, not a checkpoint load).
    w = jax.random.normal(k2, (D, D), dtype=jnp.float32) * (1.0 / jnp.sqrt(D))
    b = jax.random.normal(k3, (D,), dtype=jnp.float32) * 0.01
    gamma = jnp.ones((D,), dtype=jnp.float32)   # nn.LayerNorm weight init
    beta = jnp.zeros((D,), dtype=jnp.float32)   # nn.LayerNorm bias init

    out = jax.block_until_ready(residual_forward(x, w, b, gamma, beta))
    ref = residual_reference(x, w, b, gamma, beta)
    assert out.shape == (B, S, D)
    assert jnp.allclose(out, ref, atol=1e-4, rtol=1e-4), "resident path mismatch"

    # 2) K-streamed path, exercised explicitly at a small shape.
    D2 = 256
    x2 = jax.random.normal(k4, (B, S, D2), dtype=jnp.float32)
    w2 = jax.random.normal(k5, (D2, D2), dtype=jnp.float32) * (1.0 / jnp.sqrt(D2))
    b2 = jax.random.normal(k6, (D2,), dtype=jnp.float32) * 0.01
    g2 = jnp.ones((D2,), dtype=jnp.float32)
    be2 = jnp.zeros((D2,), dtype=jnp.float32)

    out2 = jax.block_until_ready(
        residual_forward(x2, w2, b2, g2, be2, force_stream=True))
    ref2 = residual_reference(x2, w2, b2, g2, be2)
    assert out2.shape == (B, S, D2)
    assert jnp.allclose(out2, ref2, atol=1e-4, rtol=1e-4), "streamed path mismatch"

    print("KERNEL_OK")
</pallas_src>

<mosaic_0001>
module attributes {stable_mosaic.version = 11 : i64} {
  func.func @_kernel_resident(%arg0: i32, %arg1: memref<16x128xf32, #tpu.memory_space<vmem>>, %arg2: memref<128x128xf32, #tpu.memory_space<vmem>>, %arg3: memref<1x128xf32, #tpu.memory_space<vmem>>, %arg4: memref<1x128xf32, #tpu.memory_space<vmem>>, %arg5: memref<1x128xf32, #tpu.memory_space<vmem>>, %arg6: memref<16x128xf32, #tpu.memory_space<vmem>>) attributes {dimension_semantics = [#tpu.dimension_semantics<parallel>], iteration_bounds = array<i64: 1>, scalar_prefetch = 0 : i64, scratch_operands = 0 : i64, tpu.core_type = #tpu.core_type<tc>, window_params = [{transform_indices = @transform_0, window_bounds = array<i64: 16, 128>}, {pipeline_mode = #tpu.pipeline_mode<synchronous>, transform_indices = @transform_1, window_bounds = array<i64: 128, 128>}, {pipeline_mode = #tpu.pipeline_mode<synchronous>, transform_indices = @transform_2, window_bounds = array<i64: 1, 128>}, {pipeline_mode = #tpu.pipeline_mode<synchronous>, transform_indices = @transform_3, window_bounds = array<i64: 1, 128>}, {pipeline_mode = #tpu.pipeline_mode<synchronous>, transform_indices = @transform_4, window_bounds = array<i64: 1, 128>}, {transform_indices = @transform_5, window_bounds = array<i64: 16, 128>}]} {
    %c0 = arith.constant 0 : index
    %c0_0 = arith.constant 0 : index
    %0 = vector.load %arg1[%c0, %c0_0] : memref<16x128xf32, #tpu.memory_space<vmem>>, vector<16x128xf32>
    %c0_1 = arith.constant 0 : index
    %c0_2 = arith.constant 0 : index
    %1 = vector.load %arg2[%c0_1, %c0_2] : memref<128x128xf32, #tpu.memory_space<vmem>>, vector<128x128xf32>
    %cst = arith.constant dense<0.000000e+00> : vector<16x128xf32>
    %2 = tpu.matmul %0, %1, %cst {dimension_numbers = #tpu.dot_dimension_numbers<[1], [0], [0], [1], [0, 0, 1, 1], [], []>} : vector<16x128xf32>, vector<128x128xf32>, vector<16x128xf32> -> vector<16x128xf32>
    %c0_3 = arith.constant 0 : index
    %c0_4 = arith.constant 0 : index
    %3 = vector.load %arg1[%c0_3, %c0_4] : memref<16x128xf32, #tpu.memory_space<vmem>>, vector<16x128xf32>
    %4 = arith.addf %3, %2 : vector<16x128xf32>
    %c0_5 = arith.constant 0 : index
    %c0_6 = arith.constant 0 : index
    %5 = vector.load %arg3[%c0_5, %c0_6] : memref<1x128xf32, #tpu.memory_space<vmem>>, vector<1x128xf32>
    %6 = vector.broadcast %5 : vector<1x128xf32> to vector<16x128xf32>
    %7 = arith.addf %4, %6 : vector<16x128xf32>
    %cst_7 = arith.constant dense<0.000000e+00> : vector<16xf32>
    %8 = vector.multi_reduction <add>, %7, %cst_7 [1] : vector<16x128xf32> to vector<16xf32>
    %9 = vector.shape_cast %8 : vector<16xf32> to vector<16x1xf32>
    %cst_8 = arith.constant 1.280000e+02 : f32
    %10 = vector.broadcast %cst_8 : f32 to vector<16x1xf32>
    %11 = arith.divf %9, %10 : vector<16x1xf32>
    %12 = vector.broadcast %11 : vector<16x1xf32> to vector<16x128xf32>
    %13 = arith.subf %7, %12 : vector<16x128xf32>
    %14 = arith.mulf %13, %13 : vector<16x128xf32>
    %cst_9 = arith.constant dense<0.000000e+00> : vector<16xf32>
    %15 = vector.multi_reduction <add>, %14, %cst_9 [1] : vector<16x128xf32> to vector<16xf32>
    %16 = vector.shape_cast %15 : vector<16xf32> to vector<16x1xf32>
    %cst_10 = arith.constant 1.280000e+02 : f32
    %17 = vector.broadcast %cst_10 : f32 to vector<16x1xf32>
    %18 = arith.divf %16, %17 : vector<16x1xf32>
    %cst_11 = arith.constant 9.99999974E-6 : f32
    %19 = vector.broadcast %cst_11 : f32 to vector<16x1xf32>
    %20 = arith.addf %18, %19 : vector<16x1xf32>
    %21 = math.rsqrt %20 : vector<16x1xf32>
    %22 = vector.broadcast %21 : vector<16x1xf32> to vector<16x128xf32>
    %23 = arith.mulf %13, %22 : vector<16x128xf32>
    %c0_12 = arith.constant 0 : index
    %c0_13 = arith.constant 0 : index
    %24 = vector.load %arg4[%c0_12, %c0_13] : memref<1x128xf32, #tpu.memory_space<vmem>>, vector<1x128xf32>
    %25 = vector.broadcast %24 : vector<1x128xf32> to vector<16x128xf32>
    %26 = arith.mulf %23, %25 : vector<16x128xf32>
    %c0_14 = arith.constant 0 : index
    %c0_15 = arith.constant 0 : index
    %27 = vector.load %arg5[%c0_14, %c0_15] : memref<1x128xf32, #tpu.memory_space<vmem>>, vector<1x128xf32>
    %28 = vector.broadcast %27 : vector<1x128xf32> to vector<16x128xf32>
    %29 = arith.addf %26, %28 : vector<16x128xf32>
    %c0_16 = arith.constant 0 : index
    %c0_17 = arith.constant 0 : index
    %30 = vector.load %arg6[%c0_16, %c0_17] : memref<16x128xf32, #tpu.memory_space<vmem>>, vector<16x128xf32>
    tpu.vector_store %arg6[%c0_16, %c0_17], %29 {strides = array<i32>} : memref<16x128xf32, #tpu.memory_space<vmem>>, vector<16x128xf32>,
    return
  }
  func.func @transform_0(%arg0: i32) -> (i32, i32) {
    %c0_i32 = arith.constant 0 : i32
    %c0_i32_0 = arith.constant 0 : i32
    return %arg0, %c0_i32 : i32, i32
  }
  func.func @transform_1(%arg0: i32) -> (i32, i32) {
    %c0_i32 = arith.constant 0 : i32
    %c0_i32_0 = arith.constant 0 : i32
    %c0_i32_1 = arith.constant 0 : i32
    return %c0_i32, %c0_i32_0 : i32, i32
  }
  func.func @transform_2(%arg0: i32) -> (i32, i32) {
    %c0_i32 = arith.constant 0 : i32
    %c0_i32_0 = arith.constant 0 : i32
    %c0_i32_1 = arith.constant 0 : i32
    return %c0_i32, %c0_i32_0 : i32, i32
  }
  func.func @transform_3(%arg0: i32) -> (i32, i32) {
    %c0_i32 = arith.constant 0 : i32
    %c0_i32_0 = arith.constant 0 : i32
    %c0_i32_1 = arith.constant 0 : i32
    return %c0_i32, %c0_i32_0 : i32, i32
  }
  func.func @transform_4(%arg0: i32) -> (i32, i32) {
    %c0_i32 = arith.constant 0 : i32
    %c0_i32_0 = arith.constant 0 : i32
    %c0_i32_1 = arith.constant 0 : i32
    return %c0_i32, %c0_i32_0 : i32, i32
  }
  func.func @transform_5(%arg0: i32) -> (i32, i32) {
    %c0_i32 = arith.constant 0 : i32
    %c0_i32_0 = arith.constant 0 : i32
    return %arg0, %c0_i32 : i32, i32
  }
}

module attributes {stable_mosaic.version = 11 : i64} {
  func.func @_kernel_resident(%arg0: i32, %arg1: memref<16x128xf32, #tpu.memory_space<vmem>>, %arg2: memref<128x128xf32, #tpu.memory_space<vmem>>, %arg3: memref<1x128xf32, #tpu.memory_space<vmem>>, %arg4: memref<1x128xf32, #tpu.memory_space<vmem>>, %arg5: memref<1x128xf32, #tpu.memory_space<vmem>>, %arg6: memref<16x128xf32, #tpu.memory_space<vmem>>) attributes {dimension_semantics = [#tpu.dimension_semantics<parallel>], iteration_bounds = array<i64: 1>, scalar_prefetch = 0 : i64, scratch_operands = 0 : i64, tpu.core_type = #tpu.core_type<tc>, window_params = [{transform_indices = @transform_0, window_bounds = array<i64: 16, 128>}, {pipeline_mode = #tpu.pipeline_mode<synchronous>, transform_indices = @transform_1, window_bounds = array<i64: 128, 128>}, {pipeline_mode = #tpu.pipeline_mode<synchronous>, transform_indices = @transform_2, window_bounds = array<i64: 1, 128>}, {pipeline_mode = #tpu.pipeline_mode<synchronous>, transform_indices = @transform_3, window_bounds = array<i64: 1, 128>}, {pipeline_mode = #tpu.pipeline_mode<synchronous>, transform_indices = @transform_4, window_bounds = array<i64: 1, 128>}, {transform_indices = @transform_5, window_bounds = array<i64: 16, 128>}]} {
    %c0 = arith.constant 0 : index
    %c0_0 = arith.constant 0 : index
    %0 = vector.load %arg1[%c0, %c0_0] : memref<16x128xf32, #tpu.memory_space<vmem>>, vector<16x128xf32>
    %c0_1 = arith.constant 0 : index
    %c0_2 = arith.constant 0 : index
    %1 = vector.load %arg2[%c0_1, %c0_2] : memref<128x128xf32, #tpu.memory_space<vmem>>, vector<128x128xf32>
    %cst = arith.constant dense<0.000000e+00> : vector<16x128xf32>
    %2 = tpu.matmul %0, %1, %cst {dimension_numbers = #tpu.dot_dimension_numbers<[1], [0], [0], [1], [0, 0, 1, 1], [], []>} : vector<16x128xf32>, vector<128x128xf32>, vector<16x128xf32> -> vector<16x128xf32>
    %c0_3 = arith.constant 0 : index
    %c0_4 = arith.constant 0 : index
    %3 = vector.load %arg1[%c0_3, %c0_4] : memref<16x128xf32, #tpu.memory_space<vmem>>, vector<16x128xf32>
    %4 = arith.addf %3, %2 : vector<16x128xf32>
    %c0_5 = arith.constant 0 : index
    %c0_6 = arith.constant 0 : index
    %5 = vector.load %arg3[%c0_5, %c0_6] : memref<1x128xf32, #tpu.memory_space<vmem>>, vector<1x128xf32>
    %6 = vector.broadcast %5 : vector<1x128xf32> to vector<16x128xf32>
    %7 = arith.addf %4, %6 : vector<16x128xf32>
    %cst_7 = arith.constant dense<0.000000e+00> : vector<16xf32>
    %8 = vector.multi_reduction <add>, %7, %cst_7 [1] : vector<16x128xf32> to vector<16xf32>
    %9 = vector.shape_cast %8 : vector<16xf32> to vector<16x1xf32>
    %cst_8 = arith.constant 1.280000e+02 : f32
    %10 = vector.broadcast %cst_8 : f32 to vector<16x1xf32>
    %11 = arith.divf %9, %10 : vector<16x1xf32>
    %12 = vector.broadcast %11 : vector<16x1xf32> to vector<16x128xf32>
    %13 = arith.subf %7, %12 : vector<16x128xf32>
    %14 = arith.mulf %13, %13 : vector<16x128xf32>
    %cst_9 = arith.constant dense<0.000000e+00> : vector<16xf32>
    %15 = vector.multi_reduction <add>, %14, %cst_9 [1] : vector<16x128xf32> to vector<16xf32>
    %16 = vector.shape_cast %15 : vector<16xf32> to vector<16x1xf32>
    %cst_10 = arith.constant 1.280000e+02 : f32
    %17 = vector.broadcast %cst_10 : f32 to vector<16x1xf32>
    %18 = arith.divf %16, %17 : vector<16x1xf32>
    %cst_11 = arith.constant 9.99999974E-6 : f32
    %19 = vector.broadcast %cst_11 : f32 to vector<16x1xf32>
    %20 = arith.addf %18, %19 : vector<16x1xf32>
    %21 = math.rsqrt %20 : vector<16x1xf32>
    %22 = vector.broadcast %21 : vector<16x1xf32> to vector<16x128xf32>
    %23 = arith.mulf %13, %22 : vector<16x128xf32>
    %c0_12 = arith.constant 0 : index
    %c0_13 = arith.constant 0 : index
    %24 = vector.load %arg4[%c0_12, %c0_13] : memref<1x128xf32, #tpu.memory_space<vmem>>, vector<1x128xf32>
    %25 = vector.broadcast %24 : vector<1x128xf32> to vector<16x128xf32>
    %26 = arith.mulf %23, %25 : vector<16x128xf32>
    %c0_14 = arith.constant 0 : index
    %c0_15 = arith.constant 0 : index
    %27 = vector.load %arg5[%c0_14, %c0_15] : memref<1x128xf32, #tpu.memory_space<vmem>>, vector<1x128xf32>
    %28 = vector.broadcast %27 : vector<1x128xf32> to vector<16x128xf32>
    %29 = arith.addf %26, %28 : vector<16x128xf32>
    %c0_16 = arith.constant 0 : index
    %c0_17 = arith.constant 0 : index
    %30 = vector.load %arg6[%c0_16, %c0_17] : memref<16x128xf32, #tpu.memory_space<vmem>>, vector<16x128xf32>
    tpu.vector_store %arg6[%c0_16, %c0_17], %29 {strides = array<i32>} : memref<16x128xf32, #tpu.memory_space<vmem>>, vector<16x128xf32>,
    return
  }
  func.func @transform_0(%arg0: i32) -> (i32, i32) {
    %c0_i32 = arith.constant 0 : i32
    %c0_i32_0 = arith.constant 0 : i32
    return %arg0, %c0_i32 : i32, i32
  }
  func.func @transform_1(%arg0: i32) -> (i32, i32) {
    %c0_i32 = arith.constant 0 : i32
    %c0_i32_0 = arith.constant 0 : i32
    %c0_i32_1 = arith.constant 0 : i32
    return %c0_i32, %c0_i32_0 : i32, i32
  }
  func.func @transform_2(%arg0: i32) -> (i32, i32) {
    %c0_i32 = arith.constant 0 : i32
    %c0_i32_0 = arith.constant 0 : i32
    %c0_i32_1 = arith.constant 0 : i32
    return %c0_i32, %c0_i32_0 : i32, i32
  }
  func.func @transform_3(%arg0: i32) -> (i32, i32) {
    %c0_i32 = arith.constant 0 : i32
    %c0_i32_0 = arith.constant 0 : i32
    %c0_i32_1 = arith.constant 0 : i32
    return %c0_i32, %c0_i32_0 : i32, i32
  }
  func.func @transform_4(%arg0: i32) -> (i32, i32) {
    %c0_i32 = arith.constant 0 : i32
    %c0_i32_0 = arith.constant 0 : i32
    %c0_i32_1 = arith.constant 0 : i32
    return %c0_i32, %c0_i32_0 : i32, i32
  }
  func.func @transform_5(%arg0: i32) -> (i32, i32) {
    %c0_i32 = arith.constant 0 : i32
    %c0_i32_0 = arith.constant 0 : i32
    return %arg0, %c0_i32 : i32, i32
  }
}

</mosaic_0001>

<bundles_post_ra>
// kernel: tpu_custom_call.1
= control target key start
LH: loop header
LB: loop body
LE: loop exit
PB: predicated region body
PF: predicated region fallthrough
CT: control target
= control target key end

     0   :  { %10 = vsyncpa [#allocation3], 0  ;;  %s407_s0 = inlined_call_operand.hbm [shape: f32[16,128], index: 0, kind: input, shape index: {}]   ;;  %s408_s1 = inlined_call_operand.hbm [shape: f32[128,128], index: 1, kind: input, shape index: {}]   ;;  %s409_s2 = inlined_call_operand.vmem [shape: f32[1,128], index: 2, kind: input, shape index: {}]   ;;  %s410_s3 = inlined_call_operand.vmem [shape: f32[1,128], index: 3, kind: input, shape index: {}]   ;;  %s411_s4 = inlined_call_operand.vmem [shape: f32[1,128], index: 4, kind: input, shape index: {}]   ;;  %s412_s5 = inlined_call_operand.hbm [shape: f32[16,128], index: 5, kind: output, shape index: {}]  }
   0x1   :  { %11 = vsyncpa [#allocation6], 0 }
   0x2   :  { %12 = vsyncpa [#allocation4], 0  ;;  %s345_s18 = smov [#allocation2]  }
   0x3   :  { %s18_s19 = sshll.u32 %s345_s18, 4  ;;  %s19_s19 = int_to_ptr.vmem [resolvable:$true] %s18_s19 }
   0x4   :  { %s287_s20 = scalar_lea.vmem %s19_s19, 256  ;;  %p292_p1 = scmp.lt.s32.totalorder %s19_s19, %s19_s19 }
   0x5   :  { %p288_p0 = scmp.ne.s32.totalorder %s19_s19, %s287_s20  ;;  %p293_p2 = scmp.lt.s32.totalorder %s287_s20, %s287_s20 }
   0x7   :  { %p294_p3 = por %p293_p2, %p292_p1 }
   0x9   :  { %p295_p4 = pnand %p294_p3, %p288_p0 }
   0xb   :  { %298 = shalt.err (!%p295_p4)
}
   0xc   :  { %s346_s21 = smov 128   ;;  %s347_s22 = smov 8  }
   0xd   :  { %24 = dma.hbm_to_vmem [thread:$0]  %s407_s0, 256, %s19_s19, [#allocation3], %s346_s21, %s346_s21, %s347_s22  }
   0xe   :  { %s348_s25 = smov [#allocation5]  }
   0xf   :  { %s30_s26 = sshll.u32 %s348_s25, 4  ;;  %s31_s26 = int_to_ptr.vmem [resolvable:$true] %s30_s26 }
  0x10   :  { %s307_s27 = scalar_lea.vmem %s31_s26, 2048  ;;  %p312_p6 = scmp.lt.s32.totalorder %s31_s26, %s31_s26 }
  0x11   :  { %p308_p5 = scmp.ne.s32.totalorder %s31_s26, %s307_s27  ;;  %p313_p7 = scmp.lt.s32.totalorder %s307_s27, %s307_s27 }
  0x13   :  { %p314_p8 = por %p313_p7, %p312_p6 }
  0x15   :  { %p315_p9 = pnand %p314_p8, %p308_p5 }
  0x17   :  { %318 = shalt.err (!%p315_p9)
}
  0x18   :  { %36 = dma.hbm_to_vmem [thread:$0]  %s408_s1, 2048, %s31_s26, [#allocation6], %s346_s21, %s346_s21, %s347_s22  }
  0x19   :  { %339 = dma.done.wait [#allocation3], 256  }
  0x1a   :  { %340 = vsyncadd [#allocation3], 4294967040 }
  0x1b   :  { %341 = dma.done.wait [#allocation6], 2048  }
  0x1c   :  { %342 = vsyncadd [#allocation6], 4294965248  ;;  %v66_v0 = vld [vmem:[#allocation5 + $0x78] sm:$0xff]  ;;  %v65_v1 = vld [vmem:[#allocation5 + $0x70] sm:$0xff]  ;;  %s349_s8 = smov [#allocation7]  }
  0x1d   :  { %235 = vmatprep.subr.mxu0 %v66_v0  ;;  %v64_v2 = vld [vmem:[#allocation5 + $0x68] sm:$0xff]  ;;  %v63_v3 = vld [vmem:[#allocation5 + $0x60] sm:$0xff]  ;;  %v49_v4 = vld [vmem:[#allocation2] sm:$0xff]  ;;  %s201_s9 = sshll.u32 %s349_s8, 4  ;;  %s202_s9 = int_to_ptr.vmem [resolvable:$true] %s201_s9 }
  0x1e   :  { %236 = vmatpush3.msra.mxu0 %v66_v0  ;;  %v62_v5 = vld [vmem:[#allocation5 + $0x58] sm:$0xff]  ;;  %267 = vmatprep.mubr.f32.mxu0 %v49_v4  ;;  %v61_v6 = vld [vmem:[#allocation5 + $0x50] sm:$0xff]  ;;  %v60_v7 = vld [vmem:[#allocation5 + $0x48] sm:$0xff]  ;;  %s319_s10 = scalar_lea.vmem %s202_s9, 256  ;;  %p324_p11 = scmp.lt.s32.totalorder %s202_s9, %s202_s9 }
  0x1f   :  { %237 = vmatprep.subr.mxu0 %v65_v1  ;;  %v59_v8 = vld [vmem:[#allocation5 + $0x40] sm:$0xff]  ;;  %v58_v9 = vld [vmem:[#allocation5 + $0x38] sm:$0xff]  ;;  %v57_v10 = vld [vmem:[#allocation5 + $0x30] sm:$0xff]  ;;  %p320_p10 = scmp.ne.s32.totalorder %s202_s9, %s319_s10  ;;  %p325_p12 = scmp.lt.s32.totalorder %s319_s10, %s319_s10 }
  0x20   :  { %238 = vmatpush3.msra.mxu0 %v65_v1  ;;  %v56_v11 = vld [vmem:[#allocation5 + $0x28] sm:$0xff]  ;;  %v55_v12 = vld [vmem:[#allocation5 + $0x20] sm:$0xff]  ;;  %v54_v13 = vld [vmem:[#allocation5 + $0x18] sm:$0xff] }
  0x21   :  { %239 = vmatprep.subr.mxu0 %v64_v2  ;;  %v53_v14 = vld [vmem:[#allocation5 + $0x10] sm:$0xff]  ;;  %v52_v15 = vld [vmem:[#allocation5 + $0x8] sm:$0xff]  ;;  %v51_v16 = vld [vmem:[#allocation5] sm:$0xff]  ;;  %p326_p13 = por %p325_p12, %p324_p11 }
  0x22   :  { %240 = vmatpush3.msra.mxu0 %v64_v2  ;;  %v50_v17 = vld [vmem:[#allocation2 + $0x8] sm:$0xff]  ;;  %v214_v21 = vld [vmem:[%s409_s2] ss:$0 sm:$0xff] }
  0x23   :  { %241 = vmatprep.subr.mxu0 %v63_v3  ;;  %v215_v40 = vld [vmem:[%s410_s3] ss:$0 sm:$0xff]  ;;  %p327_p0 = pnand %p326_p13, %p320_p10 }
  0x24   :  { %242 = vmatpush3.msra.mxu0 %v63_v3  ;;  %v216_v42 = vld [vmem:[%s411_s4] ss:$0 sm:$0xff] }
  0x25   :  { %243 = vmatprep.subr.mxu0 %v62_v5 }
  0x26   :  { %244 = vmatpush3.msra.mxu0 %v62_v5 }
  0x27   :  { %245 = vmatprep.subr.mxu0 %v61_v6 }
  0x28   :  { %246 = vmatpush3.msra.mxu0 %v61_v6 }
  0x29   :  { %247 = vmatprep.subr.mxu0 %v60_v7 }
  0x2a   :  { %248 = vmatpush3.msra.mxu0 %v60_v7 }
  0x2b   :  { %249 = vmatprep.subr.mxu0 %v59_v8 }
  0x2c   :  { %250 = vmatpush3.msra.mxu0 %v59_v8 }
  0x2d   :  { %251 = vmatprep.subr.mxu0 %v58_v9 }
  0x2e   :  { %252 = vmatpush3.msra.mxu0 %v58_v9 }
  0x2f   :  { %253 = vmatprep.subr.mxu0 %v57_v10 }
  0x30   :  { %254 = vmatpush3.msra.mxu0 %v57_v10 }
  0x31   :  { %255 = vmatprep.subr.mxu0 %v56_v11 }
  0x32   :  { %256 = vmatpush3.msra.mxu0 %v56_v11 }
  0x33   :  { %257 = vmatprep.subr.mxu0 %v55_v12 }
  0x34   :  { %258 = vmatpush3.msra.mxu0 %v55_v12 }
  0x35   :  { %259 = vmatprep.subr.mxu0 %v54_v13 }
  0x36   :  { %260 = vmatpush3.msra.mxu0 %v54_v13 }
  0x37   :  { %261 = vmatprep.subr.mxu0 %v53_v14 }
  0x38   :  { %262 = vmatpush3.msra.mxu0 %v53_v14 }
  0x39   :  { %263 = vmatprep.subr.mxu0 %v52_v15 }
  0x3a   :  { %264 = vmatpush3.msra.mxu0 %v52_v15 }
  0x3b   :  { %265 = vmatprep.subr.mxu0 %v51_v16 }
  0x3c   :  { %266 = vmatpush3.msra.mxu0 %v51_v16 }
  0x3d   :  { %268 = vmatmul.mubr.f32.vlgmr.msra.gmra.mxu0 %v50_v17 }
  0xfd   :  { %v269_v18 = vpop.f32.mrf.mxu0 }
  0xfe   :  { %v143_v22 = vadd.f32 %v269_v18, %v50_v17 }
  0xff   :  { %v133_v19 = vpop.f32.mrf.mxu0 }
 0x100   :  { %v142_v20 = vadd.f32 %v133_v19, %v49_v4  ;;  %v152_v24 = vadd.f32 %v214_v21, %v143_v22 }
 0x102   :  { %v151_v23 = vadd.f32 %v214_v21, %v142_v20 }
 0x104   :  { %153 = vadd.xlane.f32.xlu0 %v151_v23 }
 0x108   :  { %155 = vadd.xlane.f32.xlu0 %v152_v24 }
 0x18d   :  { %v154_v25 = vpop.xlane.xlu0 %153 }
 0x18e   :  { %v158_v26 = vmul.f32 0.0078125, %v154_v25 }
 0x190   :  { %v160_v27 = vsub.f32 %v151_v23, %v158_v26 }
 0x191   :  { %v156_v28 = vpop.xlane.xlu0 %155 }
 0x192   :  { %v159_v29 = vmul.f32 0.0078125, %v156_v28  ;;  %v162_v30 = vmul.f32 %v160_v27, %v160_v27 }
 0x194   :  { %v161_v31 = vsub.f32 %v152_v24, %v159_v29  ;;  %164 = vadd.xlane.f32.xlu1 %v162_v30 }
 0x196   :  { %v163_v32 = vmul.f32 %v161_v31, %v161_v31 }
 0x198   :  { %166 = vadd.xlane.f32.xlu1 %v163_v32 }
 0x21d   :  { %v165_v33 = vpop.xlane.xlu1 %164 }
 0x21e   :  { %v168_v34 = vmul.f32 0.0078125, %v165_v33 }
 0x220   :  { %v170_v35 = vadd.f32 1e-05, %v168_v34 }
 0x221   :  { %v167_v36 = vpop.xlane.xlu1 %166 }
 0x222   :  { %275 = vrsqrt.f32 %v170_v35  ;;  %v169_v37 = vmul.f32 0.0078125, %v167_v36 }
 0x224   :  { %v171_v38 = vadd.f32 1e-05, %v169_v37 }
 0x226   :  { %277 = vrsqrt.f32 %v171_v38 }
 0x22f   :  { %v276_v39 = vpop.eup %275 }
 0x230   :  { %v174_v41 = vmul.f32 %v276_v39, %v160_v27 }
 0x232   :  { %v183_v43 = vmul.f32 %v215_v40, %v174_v41 }
 0x233   :  { %v278_v44 = vpop.eup %277 }
 0x234   :  { %v175_v45 = vmul.f32 %v278_v44, %v161_v31  ;;  %v192_v46 = vadd.f32 %v216_v42, %v183_v43 }
 0x236   :  { %v184_v47 = vmul.f32 %v215_v40, %v175_v45  ;;  %194 = vst [vmem:[#allocation7] sm:$0xff] %v192_v46 }
 0x238   :  { %v193_v48 = vadd.f32 %v216_v42, %v184_v47 }
 0x23a   :  { %195 = vst [vmem:[#allocation7 + $0x8] sm:$0xff] %v193_v48 }
 0x23b   :  { %330 = shalt.err (!%p327_p0)
}
 0x23c   :  { %207 = dma.vmem_to_hbm [thread:$0]  %s202_s9, 256, %s412_s5, [#allocation4], %s346_s21, %s346_s21, %s347_s22  }
 0x23d   :  { %343 = dma.done.wait [#allocation4], 256  }
 0x23e   :  { %344 = vsyncadd [#allocation4], 4294967040 }
 0x23f   :  { %211 = vsyncpa [#allocation3], 1 }
 0x240   :  { %212 = vsyncpa [#allocation6], 1 }
 0x241   :  { %213 = vsyncpa [#allocation4], 1 }

// kernel: tpu_custom_call.1
= control target key start
LH: loop header
LB: loop body
LE: loop exit
PB: predicated region body
PF: predicated region fallthrough
CT: control target
= control target key end

     0   :  { %10 = vsyncpa [#allocation3], 0  ;;  %s407_s0 = inlined_call_operand.hbm [shape: f32[16,128], index: 0, kind: input, shape index: {}]   ;;  %s408_s1 = inlined_call_operand.hbm [shape: f32[128,128], index: 1, kind: input, shape index: {}]   ;;  %s409_s2 = inlined_call_operand.vmem [shape: f32[1,128], index: 2, kind: input, shape index: {}]   ;;  %s410_s3 = inlined_call_operand.vmem [shape: f32[1,128], index: 3, kind: input, shape index: {}]   ;;  %s411_s4 = inlined_call_operand.vmem [shape: f32[1,128], index: 4, kind: input, shape index: {}]   ;;  %s412_s5 = inlined_call_operand.hbm [shape: f32[16,128], index: 5, kind: output, shape index: {}]  }
   0x1   :  { %11 = vsyncpa [#allocation6], 0 }
   0x2   :  { %12 = vsyncpa [#allocation4], 0  ;;  %s345_s18 = smov [#allocation2]  }
   0x3   :  { %s18_s19 = sshll.u32 %s345_s18, 4  ;;  %s19_s19 = int_to_ptr.vmem [resolvable:$true] %s18_s19 }
   0x4   :  { %s287_s20 = scalar_lea.vmem %s19_s19, 256  ;;  %p292_p1 = scmp.lt.s32.totalorder %s19_s19, %s19_s19 }
   0x5   :  { %p288_p0 = scmp.ne.s32.totalorder %s19_s19, %s287_s20  ;;  %p293_p2 = scmp.lt.s32.totalorder %s287_s20, %s287_s20 }
   0x7   :  { %p294_p3 = por %p293_p2, %p292_p1 }
   0x9   :  { %p295_p4 = pnand %p294_p3, %p288_p0 }
   0xb   :  { %298 = shalt.err (!%p295_p4)
}
   0xc   :  { %s346_s21 = smov 128   ;;  %s347_s22 = smov 8  }
   0xd   :  { %24 = dma.hbm_to_vmem [thread:$0]  %s407_s0, 256, %s19_s19, [#allocation3], %s346_s21, %s346_s21, %s347_s22  }
   0xe   :  { %s348_s25 = smov [#allocation5]  }
   0xf   :  { %s30_s26 = sshll.u32 %s348_s25, 4  ;;  %s31_s26 = int_to_ptr.vmem [resolvable:$true] %s30_s26 }
  0x10   :  { %s307_s27 = scalar_lea.vmem %s31_s26, 2048  ;;  %p312_p6 = scmp.lt.s32.totalorder %s31_s26, %s31_s26 }
  0x11   :  { %p308_p5 = scmp.ne.s32.totalorder %s31_s26, %s307_s27  ;;  %p313_p7 = scmp.lt.s32.totalorder %s307_s27, %s307_s27 }
  0x13   :  { %p314_p8 = por %p313_p7, %p312_p6 }
  0x15   :  { %p315_p9 = pnand %p314_p8, %p308_p5 }
  0x17   :  { %318 = shalt.err (!%p315_p9)
}
  0x18   :  { %36 = dma.hbm_to_vmem [thread:$0]  %s408_s1, 2048, %s31_s26, [#allocation6], %s346_s21, %s346_s21, %s347_s22  }
  0x19   :  { %339 = dma.done.wait [#allocation3], 256  }
  0x1a   :  { %340 = vsyncadd [#allocation3], 4294967040 }
  0x1b   :  { %341 = dma.done.wait [#allocation6], 2048  }
  0x1c   :  { %342 = vsyncadd [#allocation6], 4294965248  ;;  %v66_v0 = vld [vmem:[#allocation5 + $0x78] sm:$0xff]  ;;  %v65_v1 = vld [vmem:[#allocation5 + $0x70] sm:$0xff]  ;;  %s349_s8 = smov [#allocation7]  }
  0x1d   :  { %235 = vmatprep.subr.mxu0 %v66_v0  ;;  %v64_v2 = vld [vmem:[#allocation5 + $0x68] sm:$0xff]  ;;  %v63_v3 = vld [vmem:[#allocation5 + $0x60] sm:$0xff]  ;;  %v49_v4 = vld [vmem:[#allocation2] sm:$0xff]  ;;  %s201_s9 = sshll.u32 %s349_s8, 4  ;;  %s202_s9 = int_to_ptr.vmem [resolvable:$true] %s201_s9 }
  0x1e   :  { %236 = vmatpush3.msra.mxu0 %v66_v0  ;;  %v62_v5 = vld [vmem:[#allocation5 + $0x58] sm:$0xff]  ;;  %267 = vmatprep.mubr.f32.mxu0 %v49_v4  ;;  %v61_v6 = vld [vmem:[#allocation5 + $0x50] sm:$0xff]  ;;  %v60_v7 = vld [vmem:[#allocation5 + $0x48] sm:$0xff]  ;;  %s319_s10 = scalar_lea.vmem %s202_s9, 256  ;;  %p324_p11 = scmp.lt.s32.totalorder %s202_s9, %s202_s9 }
  0x1f   :  { %237 = vmatprep.subr.mxu0 %v65_v1  ;;  %v59_v8 = vld [vmem:[#allocation5 + $0x40] sm:$0xff]  ;;  %v58_v9 = vld [vmem:[#allocation5 + $0x38] sm:$0xff]  ;;  %v57_v10 = vld [vmem:[#allocation5 + $0x30] sm:$0xff]  ;;  %p320_p10 = scmp.ne.s32.totalorder %s202_s9, %s319_s10  ;;  %p325_p12 = scmp.lt.s32.totalorder %s319_s10, %s319_s10 }
  0x20   :  { %238 = vmatpush3.msra.mxu0 %v65_v1  ;;  %v56_v11 = vld [vmem:[#allocation5 + $0x28] sm:$0xff]  ;;  %v55_v12 = vld [vmem:[#allocation5 + $0x20] sm:$0xff]  ;;  %v54_v13 = vld [vmem:[#allocation5 + $0x18] sm:$0xff] }
  0x21   :  { %239 = vmatprep.subr.mxu0 %v64_v2  ;;  %v53_v14 = vld [vmem:[#allocation5 + $0x10] sm:$0xff]  ;;  %v52_v15 = vld [vmem:[#allocation5 + $0x8] sm:$0xff]  ;;  %v51_v16 = vld [vmem:[#allocation5] sm:$0xff]  ;;  %p326_p13 = por %p325_p12, %p324_p11 }
  0x22   :  { %240 = vmatpush3.msra.mxu0 %v64_v2  ;;  %v50_v17 = vld [vmem:[#allocation2 + $0x8] sm:$0xff]  ;;  %v214_v21 = vld [vmem:[%s409_s2] ss:$0 sm:$0xff] }
  0x23   :  { %241 = vmatprep.subr.mxu0 %v63_v3  ;;  %v215_v40 = vld [vmem:[%s410_s3] ss:$0 sm:$0xff]  ;;  %p327_p0 = pnand %p326_p13, %p320_p10 }
  0x24   :  { %242 = vmatpush3.msra.mxu0 %v63_v3  ;;  %v216_v42 = vld [vmem:[%s411_s4] ss:$0 sm:$0xff] }
  0x25   :  { %243 = vmatprep.subr.mxu0 %v62_v5 }
  0x26   :  { %244 = vmatpush3.msra.mxu0 %v62_v5 }
  0x27   :  { %245 = vmatprep.subr.mxu0 %v61_v6 }
  0x28   :  { %246 = vmatpush3.msra.mxu0 %v61_v6 }
  0x29   :  { %247 = vmatprep.subr.mxu0 %v60_v7 }
  0x2a   :  { %248 = vmatpush3.msra.mxu0 %v60_v7 }
  0x2b   :  { %249 = vmatprep.subr.mxu0 %v59_v8 }
  0x2c   :  { %250 = vmatpush3.msra.mxu0 %v59_v8 }
  0x2d   :  { %251 = vmatprep.subr.mxu0 %v58_v9 }
  0x2e   :  { %252 = vmatpush3.msra.mxu0 %v58_v9 }
  0x2f   :  { %253 = vmatprep.subr.mxu0 %v57_v10 }
  0x30   :  { %254 = vmatpush3.msra.mxu0 %v57_v10 }
  0x31   :  { %255 = vmatprep.subr.mxu0 %v56_v11 }
  0x32   :  { %256 = vmatpush3.msra.mxu0 %v56_v11 }
  0x33   :  { %257 = vmatprep.subr.mxu0 %v55_v12 }
  0x34   :  { %258 = vmatpush3.msra.mxu0 %v55_v12 }
  0x35   :  { %259 = vmatprep.subr.mxu0 %v54_v13 }
  0x36   :  { %260 = vmatpush3.msra.mxu0 %v54_v13 }
  0x37   :  { %261 = vmatprep.subr.mxu0 %v53_v14 }
  0x38   :  { %262 = vmatpush3.msra.mxu0 %v53_v14 }
  0x39   :  { %263 = vmatprep.subr.mxu0 %v52_v15 }
  0x3a   :  { %264 = vmatpush3.msra.mxu0 %v52_v15 }
  0x3b   :  { %265 = vmatprep.subr.mxu0 %v51_v16 }
  0x3c   :  { %266 = vmatpush3.msra.mxu0 %v51_v16 }
  0x3d   :  { %268 = vmatmul.mubr.f32.vlgmr.msra.gmra.mxu0 %v50_v17 }
  0xfd   :  { %v269_v18 = vpop.f32.mrf.mxu0 }
  0xfe   :  { %v143_v22 = vadd.f32 %v269_v18, %v50_v17 }
  0xff   :  { %v133_v19 = vpop.f32.mrf.mxu0 }
 0x100   :  { %v142_v20 = vadd.f32 %v133_v19, %v49_v4  ;;  %v152_v24 = vadd.f32 %v214_v21, %v143_v22 }
 0x102   :  { %v151_v23 = vadd.f32 %v214_v21, %v142_v20 }
 0x104   :  { %153 = vadd.xlane.f32.xlu0 %v151_v23 }
 0x108   :  { %155 = vadd.xlane.f32.xlu0 %v152_v24 }
 0x18d   :  { %v154_v25 = vpop.xlane.xlu0 %153 }
 0x18e   :  { %v158_v26 = vmul.f32 0.0078125, %v154_v25 }
 0x190   :  { %v160_v27 = vsub.f32 %v151_v23, %v158_v26 }
 0x191   :  { %v156_v28 = vpop.xlane.xlu0 %155 }
 0x192   :  { %v159_v29 = vmul.f32 0.0078125, %v156_v28  ;;  %v162_v30 = vmul.f32 %v160_v27, %v160_v27 }
 0x194   :  { %v161_v31 = vsub.f32 %v152_v24, %v159_v29  ;;  %164 = vadd.xlane.f32.xlu1 %v162_v30 }
 0x196   :  { %v163_v32 = vmul.f32 %v161_v31, %v161_v31 }
 0x198   :  { %166 = vadd.xlane.f32.xlu1 %v163_v32 }
 0x21d   :  { %v165_v33 = vpop.xlane.xlu1 %164 }
 0x21e   :  { %v168_v34 = vmul.f32 0.0078125, %v165_v33 }
 0x220   :  { %v170_v35 = vadd.f32 1e-05, %v168_v34 }
 0x221   :  { %v167_v36 = vpop.xlane.xlu1 %166 }
 0x222   :  { %275 = vrsqrt.f32 %v170_v35  ;;  %v169_v37 = vmul.f32 0.0078125, %v167_v36 }
 0x224   :  { %v171_v38 = vadd.f32 1e-05, %v169_v37 }
 0x226   :  { %277 = vrsqrt.f32 %v171_v38 }
 0x22f   :  { %v276_v39 = vpop.eup %275 }
 0x230   :  { %v174_v41 = vmul.f32 %v276_v39, %v160_v27 }
 0x232   :  { %v183_v43 = vmul.f32 %v215_v40, %v174_v41 }
 0x233   :  { %v278_v44 = vpop.eup %277 }
 0x234   :  { %v175_v45 = vmul.f32 %v278_v44, %v161_v31  ;;  %v192_v46 = vadd.f32 %v216_v42, %v183_v43 }
 0x236   :  { %v184_v47 = vmul.f32 %v215_v40, %v175_v45  ;;  %194 = vst [vmem:[#allocation7] sm:$0xff] %v192_v46 }
 0x238   :  { %v193_v48 = vadd.f32 %v216_v42, %v184_v47 }
 0x23a   :  { %195 = vst [vmem:[#allocation7 + $0x8] sm:$0xff] %v193_v48 }
 0x23b   :  { %330 = shalt.err (!%p327_p0)
}
 0x23c   :  { %207 = dma.vmem_to_hbm [thread:$0]  %s202_s9, 256, %s412_s5, [#allocation4], %s346_s21, %s346_s21, %s347_s22  }
 0x23d   :  { %343 = dma.done.wait [#allocation4], 256  }
 0x23e   :  { %344 = vsyncadd [#allocation4], 4294967040 }
 0x23f   :  { %211 = vsyncpa [#allocation3], 1 }
 0x240   :  { %212 = vsyncpa [#allocation6], 1 }
 0x241   :  { %213 = vsyncpa [#allocation4], 1 }

</bundles_post_ra>
